<compile_context>
chip_gen: v5e
topology: v5e:2x2
jax: 0.10.0
libtpu: 0.0.40
codegen_flags: <defaults>
</compile_context>

<pallas_src>
import functools

import jax
import jax.numpy as jnp
from jax.experimental import pallas as pl
from jax.experimental.pallas import tpu as pltpu


def _round_up(x, m):
    return ((x + m - 1) // m) * m


def _mlp_kernel(x_ref, w1_ref, b1_ref, w2_ref, b2_ref, w3_ref, b3_ref, o_ref):
    """Fused 3-layer MLP: relu(x@W1+b1) -> relu(.@W2+b2) -> .@W3+b3."""
    x = x_ref[...]

    # Layer 1: Linear(input -> hidden) + ReLU.   Dropout(0.3) == identity (eval).
    h1 = jnp.dot(x, w1_ref[...], preferred_element_type=jnp.float32)
    h1 = jnp.maximum(h1 + b1_ref[...], 0.0)

    # Layer 2: Linear(hidden -> hidden//2) + ReLU.  Dropout(0.2) == identity.
    h2 = jnp.dot(h1, w2_ref[...], preferred_element_type=jnp.float32)
    h2 = jnp.maximum(h2 + b2_ref[...], 0.0)

    # Layer 3: Linear(hidden//2 -> output).  Narrow (TB, 2) store; the masked
    # vst cost is trivial next to avoiding a 64x-inflated padded writeback.
    out = jnp.dot(h2, w3_ref[...], preferred_element_type=jnp.float32)
    o_ref[...] = (out + b3_ref[...]).astype(o_ref.dtype)


def prepare_params(params):
    """One-time parameter prep (hoisted out of the per-call hot path).

    Weights are stored (in, out) so the kernel computes y = x @ W + b
    (PyTorch nn.Linear stores (out, in)); biases become (1, N) f32 rows.
    """
    return (
        params["w1"].astype(jnp.float32),
        params["b1"].reshape(1, -1).astype(jnp.float32),
        params["w2"].astype(jnp.float32),
        params["b2"].reshape(1, -1).astype(jnp.float32),
        params["w3"].astype(jnp.float32),
        params["b3"].reshape(1, -1).astype(jnp.float32),
    )


@functools.partial(jax.jit, static_argnames=("block_batch",))
def healthcare_mlp_forward(x, w1, b1, w2, b2, w3, b3, *, block_batch=2048):
    """Run the fused MLP Pallas kernel.

    x:  (B, input_size) float32 (passed through untouched; no wrapper copies)
    w*: (in, out) float32, b*: (1, out) float32 (from prepare_params).
    """
    B, in_size = x.shape
    out_size = w3.shape[1]

    # --- Batch tiling --------------------------------------------------------
    # TB multiple of 8 (f32 sublane tiling).  Big tiles amortize the ~0.35 us
    # per-grid-step overhead; cap keeps double-buffered tiles well inside the
    # scoped-VMEM default on v5e (16 MiB) as well as v6e/v7x.
    TB = min(block_batch, _round_up(B, 8))
    TB = _round_up(TB, 8)
    # Keep >=2 grid steps when the batch is large enough, so the "parallel"
    # batch axis can shard across the two TensorCores on v7x.
    if B > 1024 and -(-B // TB) < 2:
        TB = _round_up(-(-B // 2), 8)
    grid = (-(-B // TB),)  # cdiv; ragged final block handled by Pallas.

    # Weights/biases: constant block index => fetched once, VMEM-resident
    # across the whole batch grid.
    resident = lambda a: pl.BlockSpec(a.shape, lambda i: (0, 0))

    flops = 2 * B * (
        w1.shape[0] * w1.shape[1]
        + w2.shape[0] * w2.shape[1]
        + w3.shape[0] * w3.shape[1]
    )
    param_bytes = sum(a.size * a.dtype.itemsize for a in (w1, b1, w2, b2, w3, b3))
    bytes_accessed = x.size * x.dtype.itemsize + param_bytes + B * out_size * 4

    return pl.pallas_call(
        _mlp_kernel,
        out_shape=jax.ShapeDtypeStruct((B, out_size), jnp.float32),
        grid=grid,
        in_specs=[
            pl.BlockSpec((TB, in_size), lambda i: (i, 0)),   # x: tiled over batch
            resident(w1), resident(b1),
            resident(w2), resident(b2),
            resident(w3), resident(b3),
        ],
        out_specs=pl.BlockSpec((TB, out_size), lambda i: (i, 0)),
        compiler_params=pltpu.CompilerParams(
            dimension_semantics=("parallel",),
            vmem_limit_bytes=32 * 1024 * 1024,
        ),
        cost_estimate=pl.CostEstimate(
            flops=flops, transcendentals=0, bytes_accessed=bytes_accessed
        ),
    )(x, w1, b1, w2, b2, w3, b3)


def init_params(key, input_size=10, hidden_size=64, output_size=2):
    """Deterministic parameter init (Kaiming-uniform-ish, like nn.Linear)."""
    ks = jax.random.split(key, 6)

    def linear(kw, kb, fan_in, fan_out):
        bound = 1.0 / jnp.sqrt(fan_in)
        # Stored as (in, out) so the kernel does x @ W.
        w = jax.random.uniform(kw, (fan_in, fan_out), jnp.float32, -bound, bound)
        b = jax.random.uniform(kb, (fan_out,), jnp.float32, -bound, bound)
        return w, b

    w1, b1 = linear(ks[0], ks[1], input_size, hidden_size)
    w2, b2 = linear(ks[2], ks[3], hidden_size, hidden_size // 2)
    w3, b3 = linear(ks[4], ks[5], hidden_size // 2, output_size)
    return {"w1": w1, "b1": b1, "w2": w2, "b2": b2, "w3": w3, "b3": b3}


def reference_forward(x, p):
    """Plain-JAX f32 reference for correctness check (eval-mode dropout)."""
    h1 = jnp.maximum(x @ p["w1"] + p["b1"], 0.0)
    h2 = jnp.maximum(h1 @ p["w2"] + p["b2"], 0.0)
    return h2 @ p["w3"] + p["b3"]


if __name__ == "__main__":
    key = jax.random.PRNGKey(0)
    k_x, k_p = jax.random.split(key)

    B, INPUT, HIDDEN, OUT = 8, 10, 64, 2
    x = jax.random.normal(k_x, (B, INPUT), jnp.float32)
    params = init_params(k_p, INPUT, HIDDEN, OUT)

    prepped = prepare_params(params)          # one-time weight/bias prep
    out = healthcare_mlp_forward(x, *prepped)
    out = jax.block_until_ready(out)

    ref = reference_forward(x, params)
    assert out.shape == (B, OUT), f"bad shape {out.shape}"
    max_err = float(jnp.max(jnp.abs(out - ref)))
    # f32 end-to-end -> tight tolerance vs the f32 reference.
    assert jnp.allclose(out, ref, atol=1e-4, rtol=1e-4), (
        f"mismatch vs reference (max abs err {max_err})"
    )

    print("KERNEL_OK")
</pallas_src>

<mosaic_0001>
module attributes {stable_mosaic.version = 11 : i64} {
  func.func @_mlp_kernel(%arg0: i32, %arg1: memref<8x10xf32, #tpu.memory_space<vmem>>, %arg2: memref<10x64xf32, #tpu.memory_space<vmem>>, %arg3: memref<1x64xf32, #tpu.memory_space<vmem>>, %arg4: memref<64x32xf32, #tpu.memory_space<vmem>>, %arg5: memref<1x32xf32, #tpu.memory_space<vmem>>, %arg6: memref<32x2xf32, #tpu.memory_space<vmem>>, %arg7: memref<1x2xf32, #tpu.memory_space<vmem>>, %arg8: memref<8x2xf32, #tpu.memory_space<vmem>>) attributes {dimension_semantics = [#tpu.dimension_semantics<parallel>], iteration_bounds = array<i64: 1>, scalar_prefetch = 0 : i64, scratch_operands = 0 : i64, tpu.core_type = #tpu.core_type<tc>, window_params = [{transform_indices = @transform_0, window_bounds = array<i64: 8, 10>}, {pipeline_mode = #tpu.pipeline_mode<synchronous>, transform_indices = @transform_1, window_bounds = array<i64: 10, 64>}, {pipeline_mode = #tpu.pipeline_mode<synchronous>, transform_indices = @transform_2, window_bounds = array<i64: 1, 64>}, {pipeline_mode = #tpu.pipeline_mode<synchronous>, transform_indices = @transform_3, window_bounds = array<i64: 64, 32>}, {pipeline_mode = #tpu.pipeline_mode<synchronous>, transform_indices = @transform_4, window_bounds = array<i64: 1, 32>}, {pipeline_mode = #tpu.pipeline_mode<synchronous>, transform_indices = @transform_5, window_bounds = array<i64: 32, 2>}, {pipeline_mode = #tpu.pipeline_mode<synchronous>, transform_indices = @transform_6, window_bounds = array<i64: 1, 2>}, {transform_indices = @transform_7, window_bounds = array<i64: 8, 2>}]} {
    %c0 = arith.constant 0 : index
    %c0_0 = arith.constant 0 : index
    %0 = vector.load %arg1[%c0, %c0_0] : memref<8x10xf32, #tpu.memory_space<vmem>>, vector<8x10xf32>
    %c0_1 = arith.constant 0 : index
    %c0_2 = arith.constant 0 : index
    %1 = vector.load %arg2[%c0_1, %c0_2] : memref<10x64xf32, #tpu.memory_space<vmem>>, vector<10x64xf32>
    %cst = arith.constant dense<0.000000e+00> : vector<8x64xf32>
    %2 = tpu.matmul %0, %1, %cst {dimension_numbers = #tpu.dot_dimension_numbers<[1], [0], [0], [1], [0, 0, 1, 1], [], []>} : vector<8x10xf32>, vector<10x64xf32>, vector<8x64xf32> -> vector<8x64xf32>
    %c0_3 = arith.constant 0 : index
    %c0_4 = arith.constant 0 : index
    %3 = vector.load %arg3[%c0_3, %c0_4] : memref<1x64xf32, #tpu.memory_space<vmem>>, vector<1x64xf32>
    %4 = vector.broadcast %3 : vector<1x64xf32> to vector<8x64xf32>
    %5 = arith.addf %2, %4 : vector<8x64xf32>
    %cst_5 = arith.constant 0.000000e+00 : f32
    %6 = vector.broadcast %cst_5 : f32 to vector<8x64xf32>
    %7 = arith.maximumf %5, %6 : vector<8x64xf32>
    %c0_6 = arith.constant 0 : index
    %c0_7 = arith.constant 0 : index
    %8 = vector.load %arg4[%c0_6, %c0_7] : memref<64x32xf32, #tpu.memory_space<vmem>>, vector<64x32xf32>
    %cst_8 = arith.constant dense<0.000000e+00> : vector<8x32xf32>
    %9 = tpu.matmul %7, %8, %cst_8 {dimension_numbers = #tpu.dot_dimension_numbers<[1], [0], [0], [1], [0, 0, 1, 1], [], []>} : vector<8x64xf32>, vector<64x32xf32>, vector<8x32xf32> -> vector<8x32xf32>
    %c0_9 = arith.constant 0 : index
    %c0_10 = arith.constant 0 : index
    %10 = vector.load %arg5[%c0_9, %c0_10] : memref<1x32xf32, #tpu.memory_space<vmem>>, vector<1x32xf32>
    %11 = vector.broadcast %10 : vector<1x32xf32> to vector<8x32xf32>
    %12 = arith.addf %9, %11 : vector<8x32xf32>
    %cst_11 = arith.constant 0.000000e+00 : f32
    %13 = vector.broadcast %cst_11 : f32 to vector<8x32xf32>
    %14 = arith.maximumf %12, %13 : vector<8x32xf32>
    %c0_12 = arith.constant 0 : index
    %c0_13 = arith.constant 0 : index
    %15 = vector.load %arg6[%c0_12, %c0_13] : memref<32x2xf32, #tpu.memory_space<vmem>>, vector<32x2xf32>
    %cst_14 = arith.constant dense<0.000000e+00> : vector<8x2xf32>
    %16 = tpu.matmul %14, %15, %cst_14 {dimension_numbers = #tpu.dot_dimension_numbers<[1], [0], [0], [1], [0, 0, 1, 1], [], []>} : vector<8x32xf32>, vector<32x2xf32>, vector<8x2xf32> -> vector<8x2xf32>
    %c0_15 = arith.constant 0 : index
    %c0_16 = arith.constant 0 : index
    %17 = vector.load %arg7[%c0_15, %c0_16] : memref<1x2xf32, #tpu.memory_space<vmem>>, vector<1x2xf32>
    %18 = vector.broadcast %17 : vector<1x2xf32> to vector<8x2xf32>
    %19 = arith.addf %16, %18 : vector<8x2xf32>
    %c0_17 = arith.constant 0 : index
    %c0_18 = arith.constant 0 : index
    %20 = vector.load %arg8[%c0_17, %c0_18] : memref<8x2xf32, #tpu.memory_space<vmem>>, vector<8x2xf32>
    tpu.vector_store %arg8[%c0_17, %c0_18], %19 {strides = array<i32>} : memref<8x2xf32, #tpu.memory_space<vmem>>, vector<8x2xf32>,
    return
  }
  func.func @transform_0(%arg0: i32) -> (i32, i32) {
    %c0_i32 = arith.constant 0 : i32
    %c0_i32_0 = arith.constant 0 : i32
    return %arg0, %c0_i32 : i32, i32
  }
  func.func @transform_1(%arg0: i32) -> (i32, i32) {
    %c0_i32 = arith.constant 0 : i32
    %c0_i32_0 = arith.constant 0 : i32
    %c0_i32_1 = arith.constant 0 : i32
    return %c0_i32, %c0_i32_0 : i32, i32
  }
  func.func @transform_2(%arg0: i32) -> (i32, i32) {
    %c0_i32 = arith.constant 0 : i32
    %c0_i32_0 = arith.constant 0 : i32
    %c0_i32_1 = arith.constant 0 : i32
    return %c0_i32, %c0_i32_0 : i32, i32
  }
  func.func @transform_3(%arg0: i32) -> (i32, i32) {
    %c0_i32 = arith.constant 0 : i32
    %c0_i32_0 = arith.constant 0 : i32
    %c0_i32_1 = arith.constant 0 : i32
    return %c0_i32, %c0_i32_0 : i32, i32
  }
  func.func @transform_4(%arg0: i32) -> (i32, i32) {
    %c0_i32 = arith.constant 0 : i32
    %c0_i32_0 = arith.constant 0 : i32
    %c0_i32_1 = arith.constant 0 : i32
    return %c0_i32, %c0_i32_0 : i32, i32
  }
  func.func @transform_5(%arg0: i32) -> (i32, i32) {
    %c0_i32 = arith.constant 0 : i32
    %c0_i32_0 = arith.constant 0 : i32
    %c0_i32_1 = arith.constant 0 : i32
    return %c0_i32, %c0_i32_0 : i32, i32
  }
  func.func @transform_6(%arg0: i32) -> (i32, i32) {
    %c0_i32 = arith.constant 0 : i32
    %c0_i32_0 = arith.constant 0 : i32
    %c0_i32_1 = arith.constant 0 : i32
    return %c0_i32, %c0_i32_0 : i32, i32
  }
  func.func @transform_7(%arg0: i32) -> (i32, i32) {
    %c0_i32 = arith.constant 0 : i32
    %c0_i32_0 = arith.constant 0 : i32
    return %arg0, %c0_i32 : i32, i32
  }
}

</mosaic_0001>

<bundles_post_ra>
// kernel: healthcare_mlp_forward.1
= control target key start
LH: loop header
LB: loop body
LE: loop exit
PB: predicated region body
PF: predicated region fallthrough
CT: control target
= control target key end

     0   :  { %vm37_vm0 = vcmask 1041408   ;;  %vm33_vm1 = vcmask 80896   ;;  %vm74_vm2 = vcmask 523264   ;;  %vm107_vm3 = vcmask 261120   ;;  %s241_s1 = inlined_call_operand.vmem [shape: f32[10,64], index: 1, kind: input, shape index: {}]   ;;  %s242_s0 = inlined_call_operand.vmem [shape: f32[8,10], index: 0, kind: input, shape index: {}]   ;;  %s243_s3 = inlined_call_operand.vmem [shape: f32[64,32], index: 3, kind: input, shape index: {}]   ;;  %s244_s2 = inlined_call_operand.vmem [shape: f32[1,64], index: 2, kind: input, shape index: {}]   ;;  %s245_s4 = inlined_call_operand.vmem [shape: f32[1,32], index: 4, kind: input, shape index: {}]   ;;  %s246_s5 = inlined_call_operand.vmem [shape: f32[32,2], index: 5, kind: input, shape index: {}]   ;;  %s247_s6 = inlined_call_operand.vmem [shape: f32[1,2], index: 6, kind: input, shape index: {}]   ;;  %s248_s7 = inlined_call_operand.vmem [shape: f32[8,2], index: 7, kind: output, shape index: {}]  }
   0x1   :  { %v28_v0 = vld [vmem:[%s241_s1 + $0x8] sm:$0x3]  ;;  %v27_v1 = vld [vmem:[%s241_s1] sm:$0xff]  ;;  %v69_v3 = vld [vmem:[%s243_s3 + $0x38] sm:$0xff]  ;;  %vm131_vm4 = vcmask 15360  }
   0x2   :  { %137 = vmatpush.msk.msra.mxu0 %vm37_vm0, %v28_v0  ;;  %v26_v2 = vld [vmem:[%s242_s0] sm:$0xff]  ;;  %v68_v4 = vld [vmem:[%s243_s3 + $0x30] sm:$0xff]  ;;  %86 = vmatpush.msra.mxu1 %v69_v3  ;;  %v67_v5 = vld [vmem:[%s243_s3 + $0x28] sm:$0xff] }
   0x3   :  { %v66_v6 = vld [vmem:[%s243_s3 + $0x20] sm:$0xff]  ;;  %v65_v7 = vld [vmem:[%s243_s3 + $0x18] sm:$0xff]  ;;  %v64_v8 = vld [vmem:[%s243_s3 + $0x10] sm:$0xff] }
   0x4   :  { %56 = vmatpush.msra.mxu0 %v27_v1  ;;  %87 = vmatpush.msra.mxu1 %v68_v4  ;;  %v63_v9 = vld [vmem:[%s243_s3 + $0x8] sm:$0xff]  ;;  %v62_v10 = vld [vmem:[%s243_s3] sm:$0xff]  ;;  %v102_v11 = vld [vmem:[%s246_s5 + $0x18] sm:$0xff] }
   0x5   :  { %138 = vmatmul.msk.f32.vlgmr.msra.gmra.mxu0 %vm33_vm1, %v26_v2  ;;  %123 = vmatpush.msra.mxu2 %v102_v11  ;;  %v141_v12 = vld [vmem:[%s244_s2] ss:$0 sm:$0xff]  ;;  %v101_v16 = vld [vmem:[%s246_s5 + $0x10] sm:$0xff]  ;;  %v100_v17 = vld [vmem:[%s246_s5 + $0x8] sm:$0xff] }
   0x6   :  { %88 = vmatpush.msra.mxu1 %v67_v5  ;;  %v99_v18 = vld [vmem:[%s246_s5] sm:$0xff] }
   0x7   :  { %124 = vmatpush.msra.mxu2 %v101_v16  ;;  %v142_v19 = vld [vmem:[%s245_s4] ss:$0 sm:$0xff] }
   0x8   :  { %89 = vmatpush.msra.mxu1 %v66_v6  ;;  %v143_v23 = vld [vmem:[%s247_s6] ss:$0 sm:$0xff] }
   0x9   :  { %125 = vmatpush.msra.mxu2 %v100_v17 }
   0xa   :  { %90 = vmatpush.msra.mxu1 %v65_v7 }
   0xb   :  { %126 = vmatpush.msra.mxu2 %v99_v18 }
   0xc   :  { %91 = vmatpush.msra.mxu1 %v64_v8 }
   0xe   :  { %92 = vmatpush.msra.mxu1 %v63_v9 }
  0x10   :  { %93 = vmatpush.msra.mxu1 %v62_v10 }
  0x82   :  { %v58_v13 = vpop.f32.mrf.mxu0 }
  0x83   :  { %v59_v14 = vadd.f32 %v141_v12, %v58_v13 }
  0x85   :  { %v61_v15 = vmax.f32 %v59_v14, 0.0 }
  0x87   :  { %139 = vmatmul.msk.f32.vlgmr.msra.gmra.mxu1 %vm74_vm2, %v61_v15 }
 0x104   :  { %v95_v20 = vpop.f32.mrf.mxu1 }
 0x105   :  { %v96_v21 = vadd.f32 %v142_v19, %v95_v20 }
 0x107   :  { %v98_v22 = vmax.f32 %v96_v21, 0.0 }
 0x109   :  { %140 = vmatmul.msk.f32.vlgmr.msra.gmra.mxu2 %vm107_vm3, %v98_v22 }
 0x18c   :  { %v128_v24 = vpop.f32.mrf.mxu2 }
 0x18d   :  { %v129_v25 = vadd.f32 %v143_v23, %v128_v24 }
 0x18f   :  { %132 = vst.msk [vmem:[%s248_s7] sm:$0xff] %vm131_vm4, %v129_v25 }

</bundles_post_ra>
